<compile_context>
chip_gen: v5e
topology: v5e:2x2
jax: 0.10.0
libtpu: 0.0.40
codegen_flags: <defaults>
</compile_context>

<pallas_src>
import functools

import jax
import jax.numpy as jnp
from jax.experimental import pallas as pl
from jax.experimental.pallas import tpu as pltpu


def _round_up(x, m):
    return ((x + m - 1) // m) * m


def _ce_kernel(logits_ref, labels_ref, loss_ref, *, ignore_lb):
    # logits_ref: (C, T)  (any float dtype; compute in f32)
    # labels_ref: (1, T)  int32
    # loss_ref  : (1, T)  float32
    logits = logits_ref[...].astype(jnp.float32)                  # (C, T)
    labels = labels_ref[...]                                      # (1, T)

    # Numerically-stable log-sum-exp over the (small) channel/sublane axis.
    m = jnp.max(logits, axis=0, keepdims=True)                    # (1, T)
    shifted = logits - m                                          # (C, T)
    lse = jnp.log(jnp.sum(jnp.exp(shifted), axis=0, keepdims=True))  # (1, T)

    # Gather the target-class logit via iota-compare + masked sum (no dynamic
    # gather, no MXU). Using the already-shifted logits: the max term cancels,
    #   loss = logsumexp(logits) - logits[label] = lse_shifted - shifted[label].
    ch = jax.lax.broadcasted_iota(jnp.int32, shifted.shape, 0)    # (C, T)
    picked = jnp.sum(jnp.where(ch == labels, shifted, 0.0),
                     axis=0, keepdims=True)                       # (1, T)
    loss = lse - picked                                           # (1, T), >= 0

    valid = labels != ignore_lb
    loss_ref[...] = jnp.where(valid, loss, 0.0).astype(loss_ref.dtype)


def per_pixel_ce(logits, labels, ignore_lb, *, target_block_bytes=2 << 20):
    """Per-pixel cross entropy with ignore_index semantics.

    logits: (N, C, H, W) float (f32 or bf16 — cast to f32 inside the kernel).
    labels: (N, 1, H, W) int.
    Returns (N*H*W,) float32 losses, 0.0 where label == ignore_lb.
    """
    N, C, H, W = logits.shape
    HW = H * W

    # Pure reshapes (NCHW is already channel-major per pixel row): no transpose,
    # no padding copy in HBM.
    logits3 = logits.reshape(N, C, HW)
    labels3 = labels.reshape(N, 1, HW).astype(jnp.int32)

    # Pick a lane-dense pixel tile giving ~target_block_bytes of logits per
    # block (multiple of 128, capped at the padded pixel extent so tiny inputs
    # don't over-allocate VMEM). 2 MiB blocks keep double-buffered logits +
    # in-body f32 intermediates well under v7x's 32 MiB scoped / 64 MiB
    # physical VMEM while still leaving many grid steps for megacore sharding.
    itemsize = jnp.dtype(logits.dtype).itemsize
    tile = (target_block_bytes // (C * itemsize)) // 128 * 128
    tile = max(128, min(tile, _round_up(HW, 128)))

    grid = (N, pl.cdiv(HW, tile))

    out = pl.pallas_call(
        functools.partial(_ce_kernel, ignore_lb=ignore_lb),
        out_shape=jax.ShapeDtypeStruct((N, 1, HW), jnp.float32),
        grid_spec=pltpu.PrefetchScalarGridSpec(
            num_scalar_prefetch=0,
            grid=grid,
            in_specs=[
                # channels on sublanes (== full dim C), pixels on lanes.
                pl.BlockSpec((None, C, tile), lambda n, p: (n, 0, p)),
                pl.BlockSpec((None, 1, tile), lambda n, p: (n, 0, p)),
            ],
            out_specs=pl.BlockSpec((None, 1, tile), lambda n, p: (n, 0, p)),
        ),
        compiler_params=pltpu.CompilerParams(
            dimension_semantics=("parallel", "parallel"),
            vmem_limit_bytes=32 * 1024 * 1024,
        ),
    )(logits3, labels3)

    return out.reshape(N * HW)


def ohem_ce_loss(logits, labels, *, thresh=0.75, n_min=100, ignore_lb=255,
                 reduction='mean', loss_weight=1.0):
    """logits: (N, C, H, W); labels: (N, 1, H, W). Returns a scalar."""
    if reduction not in ('mean', 'sum'):
        # TODO(synk): reduction='none' returns a data-dependent-size tensor in
        # PyTorch (boolean-mask / slice result); not representable under jit.
        raise NotImplementedError("only 'mean' and 'sum' reductions supported")

    thresh_val = -jnp.log(jnp.asarray(thresh, jnp.float32))

    losses = per_pixel_ce(logits, labels, ignore_lb)              # (P,) exact, no padding

    # Per-pixel CE is >= 0 and ignored pixels contribute exactly 0 (same as
    # nn.CrossEntropyLoss(ignore_index=..., reduction='none')), so zeros sort
    # to the bottom and only enter the top-n_min branch when fewer than n_min
    # pixels have positive loss — identical to the PyTorch module.
    # TODO(synk): the data-dependent descending sort / dynamic selection has no
    # clean Pallas TPU equivalent; lax.top_k on the kernel output is used. At
    # production sizes this could be replaced by in-kernel partial reductions
    # (over-threshold sum/count) plus lax.approx_max_k for the fallback branch.
    topk = jax.lax.top_k(losses, n_min + 1)[0]
    kth = topk[n_min]                                             # == sorted_desc[n_min]

    over = losses > thresh_val
    sum_over = jnp.sum(jnp.where(over, losses, 0.0))
    cnt_over = jnp.sum(over.astype(jnp.float32))

    if reduction == 'sum':
        branch_hard = sum_over
        branch_topk = jnp.sum(topk[:n_min])
    else:  # 'mean'
        branch_hard = sum_over / jnp.maximum(cnt_over, 1.0)
        branch_topk = jnp.mean(topk[:n_min])

    loss = jnp.where(kth > thresh_val, branch_hard, branch_topk)
    return loss_weight * loss


def _reference(logits, labels, thresh, n_min, ignore_lb, loss_weight):
    """Pure-JAX reference mirroring the PyTorch forward (mean reduction)."""
    N, C, H, W = logits.shape
    lab = labels.reshape(-1)
    lg = jnp.transpose(logits, (0, 2, 3, 1)).reshape(-1, C)
    lse = jax.scipy.special.logsumexp(lg, axis=-1)
    safe = jnp.where(lab == ignore_lb, 0, lab)
    picked = jnp.take_along_axis(lg, safe[:, None], axis=-1)[:, 0]
    per = jnp.where(lab == ignore_lb, 0.0, lse - picked)
    th = -jnp.log(jnp.asarray(thresh, jnp.float32))
    sorted_desc = jnp.sort(per)[::-1]
    kth = sorted_desc[n_min]
    over = per > th
    mean_over = jnp.sum(jnp.where(over, per, 0.0)) / jnp.maximum(jnp.sum(over), 1)
    mean_top = jnp.mean(sorted_desc[:n_min])
    return loss_weight * jnp.where(kth > th, mean_over, mean_top)


if __name__ == "__main__":
    key = jax.random.PRNGKey(0)
    k_logit, k_label, k_ign = jax.random.split(key, 3)

    N, C, H, W = 2, 4, 16, 16
    ignore_lb = 255
    n_min = 100          # module default (16*256*256//16) exceeds this toy size
    thresh = 0.75
    loss_weight = 1.0

    logits = jax.random.normal(k_logit, (N, C, H, W), dtype=jnp.float32) * 2.0
    labels = jax.random.randint(k_label, (N, 1, H, W), 0, C, dtype=jnp.int32)
    # sprinkle some ignored pixels
    ign_mask = jax.random.bernoulli(k_ign, 0.1, (N, 1, H, W))
    labels = jnp.where(ign_mask, ignore_lb, labels)

    out = ohem_ce_loss(logits, labels, thresh=thresh, n_min=n_min,
                       ignore_lb=ignore_lb, reduction='mean',
                       loss_weight=loss_weight)
    out = jax.block_until_ready(out)

    ref = _reference(logits, labels, thresh, n_min, ignore_lb, loss_weight)
    assert jnp.allclose(out, ref, rtol=1e-5, atol=1e-5), (out, ref)

    print("KERNEL_OK")
</pallas_src>

<mosaic_0001>
module attributes {stable_mosaic.version = 11 : i64} {
  func.func @_ce_kernel(%arg0: i32, %arg1: i32, %arg2: memref<1x4x256xf32, #tpu.memory_space<vmem>>, %arg3: memref<1x1x256xi32, #tpu.memory_space<vmem>>, %arg4: memref<1x1x256xf32, #tpu.memory_space<vmem>>) attributes {dimension_semantics = [#tpu.dimension_semantics<parallel>, #tpu.dimension_semantics<parallel>], iteration_bounds = array<i64: 2, 1>, scalar_prefetch = 0 : i64, scratch_operands = 0 : i64, tpu.core_type = #tpu.core_type<tc>, window_params = [{transform_indices = @transform_0, window_bounds = array<i64: 1, 4, 256>}, {transform_indices = @transform_1, window_bounds = array<i64: 1, 1, 256>}, {transform_indices = @transform_2, window_bounds = array<i64: 1, 1, 256>}]} {
    %c0 = arith.constant 0 : index
    %c0_0 = arith.constant 0 : index
    %c0_1 = arith.constant 0 : index
    %0 = vector.load %arg2[%c0, %c0_0, %c0_1] : memref<1x4x256xf32, #tpu.memory_space<vmem>>, vector<1x4x256xf32>
    %1 = vector.shape_cast %0 : vector<1x4x256xf32> to vector<4x256xf32>
    %c0_2 = arith.constant 0 : index
    %c0_3 = arith.constant 0 : index
    %c0_4 = arith.constant 0 : index
    %2 = vector.load %arg3[%c0_2, %c0_3, %c0_4] : memref<1x1x256xi32, #tpu.memory_space<vmem>>, vector<1x1x256xi32>
    %3 = vector.shape_cast %2 : vector<1x1x256xi32> to vector<1x256xi32>
    %cst = arith.constant dense<0xFF800000> : vector<256xf32>
    %4 = vector.multi_reduction <maximumf>, %1, %cst [0] : vector<4x256xf32> to vector<256xf32>
    %5 = vector.shape_cast %4 : vector<256xf32> to vector<1x256xf32>
    %6 = vector.broadcast %5 : vector<1x256xf32> to vector<4x256xf32>
    %7 = arith.subf %1, %6 : vector<4x256xf32>
    %8 = math.exp %7 : vector<4x256xf32>
    %cst_5 = arith.constant dense<0.000000e+00> : vector<256xf32>
    %9 = vector.multi_reduction <add>, %8, %cst_5 [0] : vector<4x256xf32> to vector<256xf32>
    %10 = vector.shape_cast %9 : vector<256xf32> to vector<1x256xf32>
    %11 = math.log %10 : vector<1x256xf32>
    %12 = tpu.iota {dimensions = array<i32: 0>} : vector<4x256xi32>
    %13 = vector.broadcast %3 : vector<1x256xi32> to vector<4x256xi32>
    %14 = arith.cmpi eq, %12, %13 : vector<4x256xi32>
    %cst_6 = arith.constant 0.000000e+00 : f32
    %15 = vector.broadcast %cst_6 : f32 to vector<4x256xf32>
    %16 = arith.select %14, %7, %15 : vector<4x256xi1>, vector<4x256xf32>
    %cst_7 = arith.constant dense<0.000000e+00> : vector<256xf32>
    %17 = vector.multi_reduction <add>, %16, %cst_7 [0] : vector<4x256xf32> to vector<256xf32>
    %18 = vector.shape_cast %17 : vector<256xf32> to vector<1x256xf32>
    %19 = arith.subf %11, %18 : vector<1x256xf32>
    %c255_i32 = arith.constant 255 : i32
    %20 = vector.broadcast %c255_i32 : i32 to vector<1x256xi32>
    %21 = arith.cmpi ne, %3, %20 : vector<1x256xi32>
    %cst_8 = arith.constant 0.000000e+00 : f32
    %22 = vector.broadcast %cst_8 : f32 to vector<1x256xf32>
    %23 = arith.select %21, %19, %22 : vector<1x256xi1>, vector<1x256xf32>
    %c0_9 = arith.constant 0 : index
    %c0_10 = arith.constant 0 : index
    %c0_11 = arith.constant 0 : index
    %24 = vector.load %arg4[%c0_9, %c0_10, %c0_11] : memref<1x1x256xf32, #tpu.memory_space<vmem>>, vector<1x1x256xf32>
    %25 = vector.shape_cast %24 : vector<1x1x256xf32> to vector<1x256xf32>
    %26 = vector.shape_cast %23 : vector<1x256xf32> to vector<1x1x256xf32>
    tpu.vector_store %arg4[%c0_9, %c0_10, %c0_11], %26 {strides = array<i32>} : memref<1x1x256xf32, #tpu.memory_space<vmem>>, vector<1x1x256xf32>,
    return
  }
  func.func @transform_0(%arg0: i32, %arg1: i32) -> (i32, i32, i32) {
    %c0_i32 = arith.constant 0 : i32
    %c0_i32_0 = arith.constant 0 : i32
    return %arg0, %c0_i32, %arg1 : i32, i32, i32
  }
  func.func @transform_1(%arg0: i32, %arg1: i32) -> (i32, i32, i32) {
    %c0_i32 = arith.constant 0 : i32
    %c0_i32_0 = arith.constant 0 : i32
    return %arg0, %c0_i32, %arg1 : i32, i32, i32
  }
  func.func @transform_2(%arg0: i32, %arg1: i32) -> (i32, i32, i32) {
    %c0_i32 = arith.constant 0 : i32
    %c0_i32_0 = arith.constant 0 : i32
    return %arg0, %c0_i32, %arg1 : i32, i32, i32
  }
}

</mosaic_0001>

<bundles_post_ra>
// kernel: tpu_custom_call.1
= control target key start
LH: loop header
LB: loop body
LE: loop exit
PB: predicated region body
PF: predicated region fallthrough
CT: control target
= control target key end

     0   :  { %7 = vsyncpa [#allocation3], 0  ;;  %s853_s0 = inlined_call_operand.hbm [shape: f32[2,4,256], index: 0, kind: input, shape index: {}]   ;;  %s854_s1 = inlined_call_operand.hbm [shape: s32[2,1,256], index: 1, kind: input, shape index: {}]   ;;  %s855_s2 = inlined_call_operand.hbm [shape: f32[2,1,256], index: 2, kind: output, shape index: {}]  }
   0x1   :  { %9 = vsyncpa [#allocation3 + $0x1], 0 }
   0x2   :  { %10 = vsyncpa [#allocation6], 0 }
   0x3   :  { %12 = vsyncpa [#allocation6 + $0x1], 0 }
   0x4   :  { %13 = vsyncpa [#allocation4], 0 }
   0x5   :  { %15 = vsyncpa [#allocation4 + $0x1], 0  ;;  %s704_s9 = smov 0   ;;  %s706_s10 = smov 0  }
   0x6   :  { %s708_s11 = smov 0   ;;  %s710_s12 = smov 0  }
   0x7   :  { %s712_s13 = smov 0   ;;  %s714_s14 = smov 0  }
   0x8 LB: > { %s450_s15 = sadd.s32 4294967295, %s687_s14   ;;  %s451_s16 = sadd.s32 4294967294, %s687_s14   ;;  %s687_s14 = sphi %s714_s14, %s21_s14   ;;  %s683_s13 = sphi %s712_s13, %s865_s13   ;;  %s679_s12 = sphi %s710_s12, %s864_s12   ;;  %s675_s11 = sphi %s708_s11, %s863_s11   ;;  %s671_s10 = sphi %s706_s10, %s862_s10   ;;  %s667_s9 = sphi %s704_s9, %s861_s9  }
   0x9   : > { %s33_s17 = sadd.s32 1, %s683_s13  ;;  %s42_s18 = sadd.s32 1, %s675_s11 }
   0xa   : > { %p35_p0 = scmp.ge.s32.totalorder %s33_s17, 2  ;;  %p49_p1 = scmp.ne.s32.totalorder %s675_s11, %s671_s10 }
   0xb   : > { %p50_p2 = scmp.eq.s32.totalorder %s687_s14, 0  ;;  %p55_p3 = scmp.ne.s32.totalorder %s671_s10, %s667_s9 }
   0xc   : > { %s867_s17 = smov (%p35_p0, %s33_s17), 0  ;;  %p56_p5 = scmp.eq.s32.totalorder %s450_s15, 0 }
   0xd   : > { %p745_p4 = por %p50_p2, %p49_p1  ;;  %s37_s20 = ssub.s32 %s683_s13, %s867_s17 }
   0xe   : > { %p109_p6 = scmp.eq.s32.totalorder %s450_s15, 1  ;;  %p40_p7 = scmp.eq.s32.totalorder %s37_s20, 0 }
   0xf   : > { %p751_p8 = por %p56_p5, %p55_p3  ;;  %p115_p10 = scmp.eq.s32.totalorder %s451_s16, 1 }
  0x10   : > { %p755_p9 = por %p109_p6, %p49_p1  ;;  %p453_p12 = scmp.ge.s32.totalorder %s687_s14, 2 }
  0x11   : > { %s760_s23 = scalar_select %p40_p7, %s675_s11, %s42_s18  }
  0x12   : > { %p762_p11 = por %p115_p10, %p55_p3  ;;  %p485_p13 = scmp.lt.s32.totalorder %s687_s14, 2 }
  0x13   : > { %s135_s25 = sand.u32 1, %s675_s11   ;;  %s467_s27 = sshll.u32 %s683_s13, 3 }
  0x14   : > { %s454_s26 = sshll.u32 %s135_s25, 3  ;;  %s146_s30 = scalar_lea.hbm %s853_s0, %s467_s27 }
  0x15   : > { %s139_s3 = scalar_lea.vmem [#allocation2], %s454_s26  ;;  %s148_s5 = sshll.u32 %s146_s30, 4  ;;  %s149_s5 = int_to_ptr.hbm [resolvable:$true] %s148_s5 }
  0x16   : > { %s150_s4 = sshll.u32 %s139_s3, 4  ;;  %p775_p0 = pnand %p485_p13, %p745_p4  ;;  %s151_s4 = int_to_ptr.vmem [resolvable:$true] %s150_s4 }
  0x17   : > { %p459_p1 = scmp.ge.s32.totalorder %s687_s14, 1  ;;  %p176_p2 = scmp.lt.s32.totalorder %s687_s14, 3 }
  0x18   : > { %s136_s7 = scalar_lea.sflag [#allocation3], %s135_s25  ;;  %s457_s8 = sshll.u32 %s135_s25, 1 }
  0x19   : > { %477 = dma.hbm_to_vmem [thread:$0]  (!%p775_p0), %s149_s5, 128, %s151_s4, %s136_s7  }
  0x1a   : > { %p177_p3 = pnand %p459_p1, %p176_p2  ;;  %s458_s15 = sshll.u32 %s683_s13, 1 }
  0x1b   : > { %s167_s20 = scalar_lea.hbm %s854_s1, %s458_s15  ;;  %s161_s26 = scalar_lea.vmem [#allocation5], %s457_s8 }
  0x1c   : > { %s171_s19 = sshll.u32 %s161_s26, 4  ;;  %s169_s27 = sshll.u32 %s167_s20, 4  ;;  %s172_s19 = int_to_ptr.vmem [resolvable:$true] %s171_s19  ;;  %s170_s27 = int_to_ptr.hbm [resolvable:$true] %s169_s27 }
  0x1d   : > { %s158_s28 = scalar_lea.sflag [#allocation6], %s135_s25  ;;  %180 = sbr.rel (%p177_p3) target bundleno = 114 (0x72), region = 28 }
  0x1e   : > { %480 = dma.hbm_to_vmem [thread:$0]  (!%p775_p0), %s170_s27, 32, %s172_s19, %s158_s28  }
  0x1f   : > { %s790_s29 = sand.u32 (!%p177_p3), 1, %s671_s10  }
  0x20   : > { %s460_s30 = sshll.u32 (!%p177_p3), %s790_s29, 3  ;;  %s183_s3 = scalar_lea.sflag (!%p177_p3), [#allocation3], %s790_s29 }
  0x21   : > { %s186_s4 = scalar_lea.vmem (!%p177_p3), [#allocation2], %s460_s30 }
  0x22   : > { %654 = dma.done.wait (%p751_p8), %s183_s3, 128  }
  0x23   : > { %656 = vsyncadd (%p751_p8), %s183_s3, 4294967168  ;;  %s461_s25 = sshll.u32 %s790_s29, 1  ;;  %s193_s5 = scalar_lea.sflag [#allocation6], %s790_s29 }
  0x24   : > { %s196_s6 = scalar_lea.vmem [#allocation5], %s461_s25 }
  0x25   : > { %658 = dma.done.wait (%p751_p8), %s193_s5, 32  }
  0x26   : > { %660 = vsyncadd (%p751_p8), %s193_s5, 4294967264  ;;  %v226_v0 = vld [vmem:[%s186_s4] sm:$0xff]  ;;  %vm234_vm0 = vcmask 1043456   ;;  %v281_v22 = vlaneseq  ;;  %v227_v23 = vld [vmem:[%s196_s6] sm:$0x3]  ;;  %s464_s21 = sshll.u32 %s679_s12, 1 }
  0x27   : > { %229 = vst [vmem:[#allocation1] ss:$2 sm:$0xff] %v226_v0  ;;  %v283_v31 = vperm.slane %v227_v23, 0  ;;  %v284_v32 = vperm.slane %v227_v23, 1  ;;  %s337_s15 = scalar_lea.hbm %s855_s2, %s464_s21  ;;  %vm315_vm3 = vcmask 1040384   ;;  %s222_s16 = scalar_lea.vmem [#allocation7], %s461_s25 }
  0x28   : > { %v282_v28 = vshrl.u32 %v281_v22, 7  ;;  %s339_s18 = sshll.u32 %s222_s16, 4  ;;  %s341_s20 = sshll.u32 %s337_s15, 4  ;;  %vm311_vm4 = vcmp.ne.s32.totalorder %v227_v23, 255  ;;  %vm321_vm5 = vcmp.lt.s32.totalorder %v281_v22, 256  ;;  %s340_s18 = int_to_ptr.vmem [resolvable:$true] %s339_s18  ;;  %s342_s20 = int_to_ptr.hbm [resolvable:$true] %s341_s20 }
  0x29   : > { %s325_s12 = scalar_lea.sflag [#allocation4], %s790_s29  ;;  %s615_s26 = sshra.s32 %s342_s20, 4  ;;  %s616_s26 = int_to_ptr.hbm [resolvable:$true] %s615_s26 }
  0x2a   : > { %vm285_vm1 = vcmp.eq.s32.totalorder %v282_v28, %v283_v31  ;;  %vm286_vm2 = vcmp.eq.s32.totalorder %v282_v28, %v284_v32  ;;  %s617_s19 = scalar_lea.hbm %s616_s26, 2  ;;  %s621_s30 = scalar_lea.hbm %s855_s2, 4 }
  0x2b   : > { %p618_p4 = scmp.ne.s32.totalorder %s616_s26, %s617_s19  ;;  %p622_p7 = scmp.lt.s32.totalorder %s616_s26, %s855_s2 }
  0x2c   : > { %p623_p8 = scmp.lt.s32.totalorder %s621_s30, %s617_s19 }
  0x2d   : > { %p619_p5 = pnand %p618_p4, %p755_p9 }
  0x2e   : > { %v230_v1 = vld.sshfl [vmem:[#allocation1] sm:$0xff pattern:$0x75316420]  ;;  %v231_v2 = vld.sshfl [vmem:[#allocation1 + $0x8] sm:$0xff pattern:$0x75316420]  ;;  %p624_p10 = por %p623_p8, %p622_p7 }
  0x2f   : > { %v235_v3 = vsel %vm234_vm0, %v230_v1, -inf  ;;  %v242_v4 = vsel %vm234_vm0, %v231_v2, -inf  ;;  %p620_p6 = pneg %p619_p5 }
  0x30   : > { %v236_v5 = vrot.slane %v235_v3, 4  ;;  %v243_v6 = vrot.slane %v242_v4, 4 }
  0x31   : > { %p625_p13 = pnand %p624_p10, %p620_p6 }
  0x32   : > { %v237_v7 = vmax.f32 %v235_v3, %v236_v5  ;;  %v244_v8 = vmax.f32 %v242_v4, %v243_v6 }
  0x34   : > { %v238_v9 = vrot.slane %v237_v7, 2  ;;  %v245_v10 = vrot.slane %v244_v8, 2 }
  0x36   : > { %v239_v11 = vmax.f32 %v237_v7, %v238_v9  ;;  %v246_v12 = vmax.f32 %v244_v8, %v245_v10 }
  0x38   : > { %v240_v13 = vrot.slane %v239_v11, 1  ;;  %v247_v14 = vrot.slane %v246_v12, 1 }
  0x3a   : > { %v248_v15 = vmax.f32 %v246_v12, %v247_v14  ;;  %v241_v16 = vmax.f32 %v239_v11, %v240_v13 }
  0x3c   : > { %v251_v17 = vrot.slane %v248_v15, 4 }
  0x3e   : > { %v252_v18 = vsel %vm234_vm0, %v241_v16, %v251_v17 }
  0x3f   : > { %v254_v19 = vsub.f32 %v226_v0, %v252_v18 }
  0x41   : > { %v255_v20 = vmul.f32 1.442695, %v254_v19 }
  0x43   : > { %535 = vpow2.f32 %v255_v20 }
  0x49   : > { %v536_v21 = vpop.eup %535 }
  0x4a   : > { %258 = vst [vmem:[#allocation1] ss:$2 sm:$0xff] %v536_v21 }
  0x51   : > { %v259_v24 = vld.sshfl [vmem:[#allocation1] sm:$0xff pattern:$0x75316420]  ;;  %v260_v25 = vld.sshfl [vmem:[#allocation1 + $0x8] sm:$0xff pattern:$0x75316420] }
  0x52   : > { %v263_v26 = vsel %vm234_vm0, %v259_v24, 0.0  ;;  %v270_v27 = vsel %vm234_vm0, %v260_v25, 0.0  ;;  %288 = vst [vmem:[#allocation1] ss:$2 sm:$0xff] %v254_v19 }
  0x53   : > { %v264_v29 = vrot.slane %v263_v26, 4  ;;  %v271_v30 = vrot.slane %v270_v27, 4 }
  0x55   : > { %v265_v33 = vadd.f32 %v264_v29, %v263_v26  ;;  %v272_v34 = vadd.f32 %v271_v30, %v270_v27 }
  0x57   : > { %v266_v35 = vrot.slane %v265_v33, 2  ;;  %v273_v36 = vrot.slane %v272_v34, 2 }
  0x59   : > { %v267_v37 = vadd.f32 %v266_v35, %v265_v33  ;;  %v274_v38 = vadd.f32 %v273_v36, %v272_v34  ;;  %v289_v39 = vld.sshfl [vmem:[#allocation1] sm:$0xff pattern:$0x75316420]  ;;  %v290_v40 = vld.sshfl [vmem:[#allocation1 + $0x8] sm:$0xff pattern:$0x75316420] }
  0x5a   : > { %v293_v41 = vsel %vm285_vm1, %v289_v39, 0.0  ;;  %v294_v42 = vsel %vm286_vm2, %v290_v40, 0.0 }
  0x5b   : > { %v268_v43 = vrot.slane %v267_v37, 1  ;;  %v275_v44 = vrot.slane %v274_v38, 1  ;;  %v295_v45 = vsel %vm234_vm0, %v293_v41, 0.0  ;;  %v302_v46 = vsel %vm234_vm0, %v294_v42, 0.0 }
  0x5c   : > { %v296_v47 = vrot.slane %v295_v45, 4  ;;  %v303_v48 = vrot.slane %v302_v46, 4 }
  0x5d   : > { %v269_v49 = vadd.f32 %v268_v43, %v267_v37  ;;  %v276_v50 = vadd.f32 %v275_v44, %v274_v38 }
  0x5e   : > { %v297_v51 = vadd.f32 %v296_v47, %v295_v45  ;;  %v304_v52 = vadd.f32 %v303_v48, %v302_v46 }
  0x5f   : > { %537 = vlog2.f32 %v269_v49 }
  0x60   : > { %539 = vlog2.f32 %v276_v50  ;;  %v298_v53 = vrot.slane %v297_v51, 2  ;;  %v305_v54 = vrot.slane %v304_v52, 2 }
  0x62   : > { %v299_v55 = vadd.f32 %v298_v53, %v297_v51  ;;  %v306_v56 = vadd.f32 %v305_v54, %v304_v52 }
  0x64   : > { %v300_v57 = vrot.slane %v299_v55, 1  ;;  %v307_v58 = vrot.slane %v306_v56, 1 }
  0x65   : > { %v538_v59 = vpop.eup %537 }
  0x66   : > { %v540_v60 = vpop.eup %539  ;;  %v308_v61 = vadd.f32 %v307_v58, %v306_v56  ;;  %v278_v62 = vmul.f32 0.6931472, %v538_v59  ;;  %v301_v0 = vadd.f32 %v300_v57, %v299_v55 }
  0x67   : > { %v280_v63 = vmul.f32 0.6931472, %v540_v60 }
  0x68   : > { %v309_v2 = vsub.f32 %v278_v62, %v301_v0 }
  0x69   : > { %v310_v1 = vsub.f32 %v280_v63, %v308_v61 }
  0x6b   : > { %v314_v3 = vrot.slane %v310_v1, 7 }
  0x6d   : > { %v316_v4 = vsel %vm315_vm3, %v309_v2, %v314_v3 }
  0x6e   : > { %v318_v5 = vsel %vm311_vm4, %v316_v4, 0.0 }
  0x6f   : > { %323 = vst.msk [vmem:[%s222_s16] sm:$0x3] %vm321_vm5, %v318_v5 }
  0x70   : > { %628 = shalt.err (!%p625_p13)
}
  0x71   : > { %472 = dma.vmem_to_hbm [thread:$0]  (%p755_p9), %s340_s18, 32, %s342_s20, %s325_s12  }
  0x72 PF: > { %s353_s29 = sand.u32 1, %s667_s9   ;;  %p482_p0 = pnand %p453_p12, %p762_p11 }
  0x73   : > { %s354_s25 = scalar_lea.sflag [#allocation4], %s353_s29 }
  0x74   : > { %p483_p1 = pneg %p482_p0 }
  0x76   : > { %662 = dma.done.wait (%p483_p1), %s354_s25, 32  }
  0x77   : > { %664 = vsyncadd (%p483_p1), %s354_s25, 4294967264  ;;  %s21_s14 = sadd.s32 1, %s687_s14   ;;  %s861_s9 = smov %s671_s10 }
  0x78   : > { %p18_p2 = scmp.ge.s32.totalorder %s21_s14, 4   ;;  %s862_s10 = smov %s675_s11 }
  0x79   : > { %s863_s11 = smov %s760_s23  ;;  %s864_s12 = smov %s683_s13 }
  0x7a   : > { %s865_s13 = smov %s867_s17  ;;  %20 = sbr.rel (!%p18_p2) target bundleno = 8 (0x8), region = 86 }
  0x7f   :  { %360 = vsyncpa [#allocation3], 1 }
  0x80   :  { %362 = vsyncpa [#allocation3 + $0x1], 1 }
  0x81   :  { %363 = vsyncpa [#allocation6], 1 }
  0x82   :  { %365 = vsyncpa [#allocation6 + $0x1], 1 }
  0x83   :  { %366 = vsyncpa [#allocation4], 1 }
  0x84   :  { %368 = vsyncpa [#allocation4 + $0x1], 1 }

</bundles_post_ra>
